<compile_context>
chip_gen: v7x
topology: tpu7x:2x2x1
jax: 0.10.0
libtpu: 0.0.40
codegen_flags: <defaults>
</compile_context>

<pallas_src>
import jax
import jax.numpy as jnp
from jax import lax
from jax.experimental import pallas as pl
from jax.experimental.pallas import tpu as pltpu

IN_FEATURES = 40      # per-node feature dim (concat -> 80, matching nn.Linear(80, C))
OUT_CLASSES = 4


def _round_up(x, m):
    return ((x + m - 1) // m) * m


def _cdiv(a, b):
    return (a + b - 1) // b


def edge_score_kernel(src_ref, dst_ref, p1t_ref, p2t_ref, out_ref):
    """One lane-dense edge tile: gather precomputed node projections, add.

    src_ref, dst_ref : (1, tile)     int32    edge endpoints for this tile
    p1t_ref          : (C, N_pad)    float32  (h @ W1).T        (VMEM resident)
    p2t_ref          : (C, N_pad)    float32  (h @ W2 + b).T    (VMEM resident)
    out_ref          : (C, tile)     float32  per-edge scores, edges on lanes
    """
    n_pad = p1t_ref.shape[1]
    tile = src_ref.shape[1]

    # Single shared iota; two compares -> exact one-hot selection matrices with
    # nodes on sublanes and edges on lanes (lane-dense everywhere).
    node_ids = lax.broadcasted_iota(jnp.int32, (n_pad, tile), 0)
    sel_u = jnp.where(src_ref[...] == node_ids, 1.0, 0.0).astype(p1t_ref.dtype)
    sel_v = jnp.where(dst_ref[...] == node_ids, 1.0, 0.0).astype(p2t_ref.dtype)

    # (C, N_pad) @ (N_pad, tile) -> (C, tile): gather + add via the MXU.
    s = jnp.dot(p1t_ref[...], sel_u, preferred_element_type=jnp.float32)
    s = s + jnp.dot(p2t_ref[...], sel_v, preferred_element_type=jnp.float32)
    out_ref[...] = s.astype(out_ref.dtype)


def mlp_predictor_forward(src, dst, h, W, b, *, tile_e=1024):
    """Pallas implementation of MLPPredictor.forward.

    src, dst : int32 [E]        edge endpoints (graph.apply_edges src/dst)
    h        : float32 [N, F]   node features (2F == W.shape[1])
    W        : float32 [C, 2F]  torch nn.Linear weight
    b        : float32 [C]      torch nn.Linear bias
    returns  : float32 [E, C]   per-edge scores
    """
    E = int(src.shape[0])
    N, F = h.shape
    C = W.shape[0]

    # ---- node-space precompute (plain XLA, done once) ---------------------
    #   concat(h_u, h_v) @ W.T + b == (h_u @ W1) + (h_v @ W2 + b)
    Wt = W.T.astype(jnp.float32)                       # (2F, C)
    P1 = h.astype(jnp.float32) @ Wt[:F]                # (N, C)
    P2 = h.astype(jnp.float32) @ Wt[F:] + b.astype(jnp.float32)  # (N, C)

    n_pad = _round_up(max(N, 8), 8)
    P1t = jnp.pad(P1, ((0, n_pad - N), (0, 0))).T      # (C, N_pad), zero rows pad
    P2t = jnp.pad(P2, ((0, n_pad - N), (0, 0))).T      # (C, N_pad)

    # ---- edge tiling: lane-dense tiles, big enough to amortise step cost ---
    tile = max(128, min(int(tile_e), _round_up(E, 128)))
    tile = _round_up(tile, 128)
    # Keep >= 2 edge tiles when possible so the "parallel" edge axis can feed
    # both TensorCores on multi-TC chips (v7x).
    if _round_up(E, tile) // tile < 2 and E > 128:
        tile = _round_up(_cdiv(E, 2), 128)
    e_pad = _round_up(E, tile)
    pad_e = e_pad - E

    # Lane-dense (1, E_pad) index rows; padded edges score node pair (0, 0)
    # and are sliced off below.
    src_p = jnp.pad(src.astype(jnp.int32), (0, pad_e)).reshape(1, e_pad)
    dst_p = jnp.pad(dst.astype(jnp.int32), (0, pad_e)).reshape(1, e_pad)

    grid = (e_pad // tile,)

    out_t = pl.pallas_call(
        edge_score_kernel,
        out_shape=jax.ShapeDtypeStruct((C, e_pad), jnp.float32),
        grid_spec=pltpu.PrefetchScalarGridSpec(
            num_scalar_prefetch=0,
            grid=grid,
            in_specs=[
                pl.BlockSpec((1, tile), lambda i: (0, i)),        # src ids (lane-dense)
                pl.BlockSpec((1, tile), lambda i: (0, i)),        # dst ids (lane-dense)
                pl.BlockSpec((C, n_pad), lambda i: (0, 0)),       # P1.T (tiny, resident)
                pl.BlockSpec((C, n_pad), lambda i: (0, 0)),       # P2.T (tiny, resident)
            ],
            out_specs=pl.BlockSpec((C, tile), lambda i: (0, i)),  # lane-dense output
        ),
        compiler_params=pltpu.CompilerParams(
            dimension_semantics=("parallel",),   # shard edge tiles across TensorCores
            vmem_limit_bytes=32 * 1024 * 1024,   # safe on v5e/v6e/v7x; resident state is tiny
        ),
    )(src_p, dst_p, P1t, P2t)

    # Back to the PyTorch orientation [E, C].
    return out_t.T[:E]


if __name__ == "__main__":
    key = jax.random.PRNGKey(0)
    k_h, k_w, k_b, k_src, k_dst = jax.random.split(key, 5)

    N = 12                     # number of nodes
    E = 300                    # number of directed edges
    F = IN_FEATURES
    C = OUT_CLASSES

    # Deterministic synthetic graph + parameters.
    h = jax.random.normal(k_h, (N, F), dtype=jnp.float32)
    W = jax.random.normal(k_w, (C, 2 * F), dtype=jnp.float32) * 0.1
    b = jax.random.normal(k_b, (C,), dtype=jnp.float32) * 0.1
    src = jax.random.randint(k_src, (E,), 0, N, dtype=jnp.int32)
    dst = jax.random.randint(k_dst, (E,), 0, N, dtype=jnp.int32)

    # Pure-JAX reference of the PyTorch forward.
    ref = jnp.concatenate([h[src], h[dst]], axis=1) @ W.T + b

    # Default tile (splits into >= 2 lane-dense tiles for multi-TC chips).
    score = mlp_predictor_forward(src, dst, h, W, b)
    score = jax.block_until_ready(score)
    assert score.shape == (E, C)
    assert jnp.allclose(score, ref, atol=1e-4, rtol=1e-4)

    # Minimum lane-dense tile (exercises a 3-step parallel grid + edge padding).
    score_small = mlp_predictor_forward(src, dst, h, W, b, tile_e=128)
    score_small = jax.block_until_ready(score_small)
    assert jnp.allclose(score_small, ref, atol=1e-4, rtol=1e-4)

    print("KERNEL_OK")
</pallas_src>

<mosaic_0001>
module attributes {stable_mosaic.version = 11 : i64} {
  func.func @edge_score_kernel(%arg0: i32, %arg1: memref<1x256xi32, #tpu.memory_space<vmem>>, %arg2: memref<1x256xi32, #tpu.memory_space<vmem>>, %arg3: memref<4x16xf32, #tpu.memory_space<vmem>>, %arg4: memref<4x16xf32, #tpu.memory_space<vmem>>, %arg5: memref<4x256xf32, #tpu.memory_space<vmem>>) attributes {dimension_semantics = [#tpu.dimension_semantics<parallel>], iteration_bounds = array<i64: 2>, scalar_prefetch = 0 : i64, scratch_operands = 0 : i64, tpu.core_type = #tpu.core_type<tc>, window_params = [{transform_indices = @transform_0, window_bounds = array<i64: 1, 256>}, {transform_indices = @transform_1, window_bounds = array<i64: 1, 256>}, {pipeline_mode = #tpu.pipeline_mode<synchronous>, transform_indices = @transform_2, window_bounds = array<i64: 4, 16>}, {pipeline_mode = #tpu.pipeline_mode<synchronous>, transform_indices = @transform_3, window_bounds = array<i64: 4, 16>}, {transform_indices = @transform_4, window_bounds = array<i64: 4, 256>}]} {
    %0 = tpu.iota {dimensions = array<i32: 0>} : vector<16x256xi32>
    %c0 = arith.constant 0 : index
    %c0_0 = arith.constant 0 : index
    %1 = vector.load %arg1[%c0, %c0_0] : memref<1x256xi32, #tpu.memory_space<vmem>>, vector<1x256xi32>
    %2 = vector.broadcast %1 : vector<1x256xi32> to vector<16x256xi32>
    %3 = arith.cmpi eq, %2, %0 : vector<16x256xi32>
    %cst = arith.constant 1.000000e+00 : f32
    %cst_1 = arith.constant 0.000000e+00 : f32
    %4 = vector.broadcast %cst : f32 to vector<16x256xf32>
    %5 = vector.broadcast %cst_1 : f32 to vector<16x256xf32>
    %6 = arith.select %3, %4, %5 : vector<16x256xi1>, vector<16x256xf32>
    %c0_2 = arith.constant 0 : index
    %c0_3 = arith.constant 0 : index
    %7 = vector.load %arg2[%c0_2, %c0_3] : memref<1x256xi32, #tpu.memory_space<vmem>>, vector<1x256xi32>
    %8 = vector.broadcast %7 : vector<1x256xi32> to vector<16x256xi32>
    %9 = arith.cmpi eq, %8, %0 : vector<16x256xi32>
    %cst_4 = arith.constant 1.000000e+00 : f32
    %cst_5 = arith.constant 0.000000e+00 : f32
    %10 = vector.broadcast %cst_4 : f32 to vector<16x256xf32>
    %11 = vector.broadcast %cst_5 : f32 to vector<16x256xf32>
    %12 = arith.select %9, %10, %11 : vector<16x256xi1>, vector<16x256xf32>
    %c0_6 = arith.constant 0 : index
    %c0_7 = arith.constant 0 : index
    %13 = vector.load %arg3[%c0_6, %c0_7] : memref<4x16xf32, #tpu.memory_space<vmem>>, vector<4x16xf32>
    %cst_8 = arith.constant dense<0.000000e+00> : vector<4x256xf32>
    %14 = tpu.matmul %13, %6, %cst_8 {dimension_numbers = #tpu.dot_dimension_numbers<[1], [0], [0], [1], [0, 0, 1, 1], [], []>} : vector<4x16xf32>, vector<16x256xf32>, vector<4x256xf32> -> vector<4x256xf32>
    %c0_9 = arith.constant 0 : index
    %c0_10 = arith.constant 0 : index
    %15 = vector.load %arg4[%c0_9, %c0_10] : memref<4x16xf32, #tpu.memory_space<vmem>>, vector<4x16xf32>
    %cst_11 = arith.constant dense<0.000000e+00> : vector<4x256xf32>
    %16 = tpu.matmul %15, %12, %cst_11 {dimension_numbers = #tpu.dot_dimension_numbers<[1], [0], [0], [1], [0, 0, 1, 1], [], []>} : vector<4x16xf32>, vector<16x256xf32>, vector<4x256xf32> -> vector<4x256xf32>
    %17 = arith.addf %14, %16 : vector<4x256xf32>
    %c0_12 = arith.constant 0 : index
    %c0_13 = arith.constant 0 : index
    %18 = vector.load %arg5[%c0_12, %c0_13] : memref<4x256xf32, #tpu.memory_space<vmem>>, vector<4x256xf32>
    tpu.vector_store %arg5[%c0_12, %c0_13], %17 {strides = array<i32>} : memref<4x256xf32, #tpu.memory_space<vmem>>, vector<4x256xf32>,
    return
  }
  func.func @transform_0(%arg0: i32) -> (i32, i32) {
    %c0_i32 = arith.constant 0 : i32
    %c0_i32_0 = arith.constant 0 : i32
    return %c0_i32, %arg0 : i32, i32
  }
  func.func @transform_1(%arg0: i32) -> (i32, i32) {
    %c0_i32 = arith.constant 0 : i32
    %c0_i32_0 = arith.constant 0 : i32
    return %c0_i32, %arg0 : i32, i32
  }
  func.func @transform_2(%arg0: i32) -> (i32, i32) {
    %c0_i32 = arith.constant 0 : i32
    %c0_i32_0 = arith.constant 0 : i32
    %c0_i32_1 = arith.constant 0 : i32
    return %c0_i32, %c0_i32_0 : i32, i32
  }
  func.func @transform_3(%arg0: i32) -> (i32, i32) {
    %c0_i32 = arith.constant 0 : i32
    %c0_i32_0 = arith.constant 0 : i32
    %c0_i32_1 = arith.constant 0 : i32
    return %c0_i32, %c0_i32_0 : i32, i32
  }
  func.func @transform_4(%arg0: i32) -> (i32, i32) {
    %c0_i32 = arith.constant 0 : i32
    %c0_i32_0 = arith.constant 0 : i32
    return %c0_i32, %arg0 : i32, i32
  }
}

</mosaic_0001>

<bundles_post_ra>
// kernel: tpu_custom_call.1
= control target key start
LH: loop header
LB: loop body
LE: loop exit
PB: predicated region body
PF: predicated region fallthrough
CT: control target
= control target key end

     0   :  { %9 = vsyncpa [#allocation3], 0  ;;  %s1028_s0 = inlined_call_operand.hbm [shape: s32[1,512], index: 0, kind: input, shape index: {}]   ;;  %s1029_s1 = inlined_call_operand.hbm [shape: s32[1,512], index: 1, kind: input, shape index: {}]   ;;  %s1030_s2 = inlined_call_operand.vmem [shape: f32[4,16], index: 2, kind: input, shape index: {}]   ;;  %s1031_s3 = inlined_call_operand.vmem [shape: f32[4,16], index: 3, kind: input, shape index: {}]   ;;  %s1032_s4 = inlined_call_operand.hbm [shape: f32[4,512], index: 4, kind: output, shape index: {}]  }
   0x1   :  { %11 = vsyncpa [#allocation3 + $0x1], 0 }
   0x2   :  { %12 = vsyncpa [#allocation6], 0 }
   0x3   :  { %14 = vsyncpa [#allocation6 + $0x1], 0 }
   0x4   :  { %15 = vsyncpa [#allocation4], 0 }
   0x5   :  { %17 = vsyncpa [#allocation4 + $0x1], 0  ;;  %s812_s15 = smov 0   ;;  %s814_s16 = smov 0  }
   0x6   :  { %s816_s17 = smov 0   ;;  %s818_s18 = smov 0  }
   0x7 LB: > { %s833_s19 = sadd.s32 4294967295, %s780_s18   ;;  %s556_s20 = sadd.s32 4294967294, %s780_s18   ;;  %s780_s18 = sphi %s818_s18, %s1051_s18   ;;  %s776_s17 = sphi %s816_s17, %s1050_s17   ;;  %s772_s16 = sphi %s814_s16, %s1049_s16   ;;  %s768_s15 = sphi %s812_s15, %s1048_s15  }
   0x8   : > { %s837_s21 = sadd.s32 1, %s780_s18   ;;  %s30_s22 = sadd.s32 1, %s776_s17 }
   0x9   : > { %s27_s23 = ssub.s32 %s780_s18, %s837_s21  ;;  %p37_p0 = scmp.ne.s32.totalorder %s776_s17, %s772_s16 }
   0xa   : > { %p28_p1 = scmp.eq.s32.totalorder %s27_s23, 0  ;;  %p38_p2 = scmp.eq.s32.totalorder %s780_s18, 0 }
   0xb   : > { %p43_p3 = scmp.ne.s32.totalorder %s772_s16, %s768_s15  ;;  %p44_p4 = scmp.eq.s32.totalorder %s833_s19, 0 }
   0xc   : > { %s849_s24 = scalar_select %p28_p1, %s776_s17, %s30_s22  }
   0xd   : > { %p851_p5 = por %p38_p2, %p37_p0  ;;  %p855_p6 = por %p44_p4, %p43_p3 }
   0xe   : > { %p135_p7 = scmp.eq.s32.totalorder %s833_s19, 1  ;;  %p141_p8 = scmp.eq.s32.totalorder %s556_s20, 1 }
   0xf   : > { %s1036_s26 = scalar_select %p855_p6, 1, 0 }
  0x10   : > { %p614_p10 = scmp.lt.s32.totalorder %s780_s18, 2  ;;  %p862_p11 = por %p135_p7, %p37_p0 }
  0x11   : > { %p866_p12 = por %p141_p8, %p43_p3  ;;  %s871_s29 = sand.u32 1, %s776_s17  }
  0x12   : > { %s1037_s27 = scalar_select %p862_p11, 1, 0 }
  0x13   : > { %s1038_s28 = scalar_select %p866_p12, 1, 0 }
  0x14   : > { %s584_s30 = sshll.u32 %s780_s18, 5  ;;  %s559_s5 = sshll.u32 %s871_s29, 1 }
  0x15   : > { %s880_s8 = scalar_lea.hbm %s1028_s0, %s584_s30  ;;  %s171_s9 = scalar_lea.vmem [#allocation2], %s559_s5 }
  0x16   : > { %s179_s10 = sshll.u32 %s171_s9, 4  ;;  %p886_p13 = pnand %p614_p10, %p851_p5  ;;  %s890_s10 = int_to_ptr.vmem [resolvable:$true] %s179_s10 }
  0x17   : > { %s168_s12 = scalar_lea.sflag [#allocation3], %s871_s29  ;;  %s650_s13 = scalar_lea.hbm %s880_s8, 32 }
  0x18   : > { %p651_p2 = scmp.ne.s32.totalorder %s880_s8, %s650_s13  ;;  %p652_p3 = pneg %p886_p13 }
  0x19   : > { %s655_s22 = scalar_lea.hbm %s1028_s0, 64  ;;  %p656_p5 = scmp.lt.u32.totalorder %s880_s8, %s1028_s0 }
  0x1a   : > { %p653_p4 = pnand %p652_p3, %p651_p2  ;;  %p657_p8 = scmp.lt.u32.totalorder %s655_s22, %s650_s13 }
  0x1b   : > { %p659_p9 = scmp.lt.u32.totalorder %s650_s13, %s880_s8 }
  0x1c   : > { %p654_p7 = pneg %p653_p4  ;;  %p658_p10 = por %p657_p8, %p656_p5 }
  0x1e   : > { %p660_p0 = por %p659_p9, %p658_p10 }
  0x20   : > { %p661_p1 = pnand %p660_p0, %p654_p7 }
  0x22   : > { %664 = shalt.err (!%p661_p1)
}
  0x23   : > { %s665_s6 = scalar_lea.vmem %s890_s10, 32  ;;  %s782_s7 = smov [#allocation2]  }
  0x24   : > { %p666_p2 = scmp.ne.s32.totalorder %s890_s10, %s665_s6  ;;  %s670_s9 = sshll.u32 %s782_s7, 4  ;;  %s671_s9 = int_to_ptr.vmem [resolvable:$false] %s670_s9 }
  0x25   : > { %s672_s14 = scalar_lea.vmem %s671_s9, 64  ;;  %p673_p11 = scmp.lt.s32.totalorder %s890_s10, %s671_s9 }
  0x26   : > { %p668_p4 = pnand %p666_p2, %p652_p3  ;;  %p674_p5 = scmp.lt.s32.totalorder %s672_s14, %s665_s6 }
  0x28   : > { %p669_p12 = pneg %p668_p4  ;;  %p675_p8 = por %p674_p5, %p673_p11 }
  0x2a   : > { %p676_p9 = pnand %p675_p8, %p669_p12 }
  0x2c   : > { %679 = shalt.err (!%p676_p9)
}
  0x2d   : > { %606 = dma.hbm_to_vmem [thread:$0]  (!%p886_p13), %s880_s8, 32, %s890_s10, %s168_s12  }
  0x2e   : > { %p1040_p0 = scmp.lt.s32.totalorder %s780_s18, 3  ;;  %p1041_p1 = scmp.ge.s32.totalorder %s780_s18, 1 }
  0x2f   : > { %s933_s23 = scalar_lea.hbm %s1029_s1, %s584_s30  ;;  %s190_s25 = scalar_lea.vmem [#allocation5], %s559_s5 }
  0x30   : > { %p924_p7 = pnand %p1041_p1, %p1040_p0  ;;  %s198_s6 = sshll.u32 %s190_s25, 4  ;;  %s199_s6 = int_to_ptr.vmem [resolvable:$true] %s198_s6 }
  0x31   : > { %s187_s8 = scalar_lea.sflag [#allocation6], %s871_s29  ;;  %s680_s10 = scalar_lea.hbm %s933_s23, 32 }
  0x32   : > { %s1042_s13 = scalar_select %p924_p7, 1, 0 }
  0x33   : > { %p681_p11 = scmp.ne.s32.totalorder %s933_s23, %s680_s10  ;;  %s685_s30 = scalar_lea.hbm %s1029_s1, 64 }
  0x34   : > { %p686_p2 = scmp.lt.u32.totalorder %s933_s23, %s1029_s1  ;;  %p687_p4 = scmp.lt.u32.totalorder %s685_s30, %s680_s10 }
  0x35   : > { %p683_p12 = pnand %p681_p11, %p652_p3  ;;  %p689_p8 = scmp.lt.u32.totalorder %s680_s10, %s933_s23 }
  0x36   : > { %p688_p5 = por %p687_p4, %p686_p2 }
  0x37   : > { %p684_p10 = pneg %p683_p12 }
  0x38   : > { %p690_p9 = por %p689_p8, %p688_p5 }
  0x3a   : > { %p691_p0 = pnand %p690_p9, %p684_p10 }
  0x3c   : > { %694 = shalt.err (!%p691_p0)
}
  0x3d   : > { %s695_s29 = scalar_lea.vmem %s199_s6, 32  ;;  %s783_s5 = smov [#allocation5]  }
  0x3e   : > { %p696_p1 = scmp.ne.s32.totalorder %s199_s6, %s695_s29  ;;  %s700_s20 = sshll.u32 %s783_s5, 4  ;;  %s701_s20 = int_to_ptr.vmem [resolvable:$false] %s700_s20 }
  0x3f   : > { %s702_s22 = scalar_lea.vmem %s701_s20, 64  ;;  %p703_p6 = scmp.lt.s32.totalorder %s199_s6, %s701_s20 }
  0x40   : > { %p698_p11 = pnand %p696_p1, %p652_p3  ;;  %p704_p7 = scmp.lt.s32.totalorder %s702_s22, %s695_s29 }
  0x42   : > { %p699_p12 = pneg %p698_p11  ;;  %p705_p2 = por %p704_p7, %p703_p6 }
  0x44   : > { %p706_p4 = pnand %p705_p2, %p699_p12 }
  0x46   : > { %709 = shalt.err (!%p706_p4)
}
  0x47   : > { %609 = dma.hbm_to_vmem [thread:$0]  (!%p886_p13), %s933_s23, 32, %s199_s6, %s187_s8  }
  0x48   : > { %p1043_p10 = scmp.ne.s32.totalorder %s1042_s13, 0 }
  0x49   : > { %s960_s25 = sand.u32 (!%p1043_p10), 1, %s772_s16   ;;  %p1044_p3 = scmp.ne.s32.totalorder (!%p1043_p10), %s1036_s26, 0 }
  0x4a   : > { %207 = sbr.rel (%p1043_p10) target bundleno = 331 (0x14b), region = 36  ;;  %s566_s10 = sshll.u32 (!%p1043_p10), %s960_s25, 1 }
  0x4b   : > { %s210_s12 = scalar_lea.sflag (!%p1043_p10), [#allocation3], %s960_s25  ;;  %s213_s7 = scalar_lea.vmem (!%p1043_p10), [#allocation2], %s566_s10 }
  0x51   : > { %755 = dma.done.wait (%p1044_p3), %s210_s12, 32  }
  0x52   : > { %757 = vsyncadd (%p1044_p3), %s210_s12, 4294967264  ;;  %s219_s11 = scalar_lea.sflag [#allocation6], %s960_s25  ;;  %s222_s23 = scalar_lea.vmem [#allocation5], %s566_s10 }
  0x53   : > { %759 = dma.done.wait (%p1044_p3), %s219_s11, 32  }
  0x54   : > { %761 = vsyncadd (%p1044_p3), %s219_s11, 4294967264  ;;  %v255_v0 = vlaneseq  ;;  %v784_v1 = vmov 0.0   ;;  %v275_v6 = vld [vmem:[%s222_s23] sm:$0x3]  ;;  %v258_v7 = vld [vmem:[%s213_s7] sm:$0x3] }
  0x55   : > { %362 = vmatprep.mubr.f32.mxu1 %v784_v1  ;;  %436 = vmatprep.mubr.f32.mxu0 %v784_v1  ;;  %v785_v12 = vmov 1.0|1.0   ;;  %v293_v13 = vld [vmem:[%s1031_s3] sm:$0xf]  ;;  %vm294_vm12 = vcmask 130048   ;;  %s568_s30 = sshll.u32 %s960_s25, 3 }
  0x56   : > { %v256_v2 = vshrl.u32 %v255_v0, 7  ;;  %v292_v14 = vld [vmem:[%s1030_s2] sm:$0xf]  ;;  %s586_s9 = sshll.u32 %s833_s19, 7  ;;  %s251_s14 = scalar_lea.vmem [#allocation7], %s568_s30 }
  0x57   : > { %s463_s29 = sshll.u32 %s251_s14, 4  ;;  %s984_s22 = scalar_lea.hbm %s1032_s4, %s586_s9  ;;  %s986_s29 = int_to_ptr.vmem [resolvable:$true] %s463_s29 }
  0x58   : > { %v265_v3 = vsub.s32 1, %v256_v2  ;;  %v261_v4 = vsub.s32 0, %v256_v2  ;;  %v257_v5 = vadd.s32 8, %v256_v2  ;;  %s449_s10 = scalar_lea.sflag [#allocation4], %s960_s25  ;;  %s710_s12 = scalar_lea.vmem %s986_s29, 128 }
  0x59   : > { %p711_p6 = scmp.ne.s32.totalorder %s986_s29, %s710_s12  ;;  %p1045_p13 = scmp.ne.s32.totalorder %s1037_s27, 0 }
  0x5a   : > { %v283_v8 = vrot.slane %v275_v6, %v265_v3  ;;  %v266_v9 = vrot.slane %v258_v7, %v265_v3  ;;  %v279_v10 = vrot.slane %v275_v6, %v261_v4  ;;  %v262_v11 = vrot.slane %v258_v7, %v261_v4  ;;  %s786_s19 = smov [#allocation7]  }
  0x5b   : > { %p712_p7 = pnand %p711_p6, %p1045_p13  ;;  %s714_s7 = sshll.u32 %s786_s19, 4  ;;  %s715_s7 = int_to_ptr.vmem [resolvable:$false] %s714_s7 }
  0x5c   : > { %vm285_vm0 = vcmp.eq.s32.totalorder %v283_v8, %v256_v2  ;;  %vm287_vm1 = vcmp.eq.s32.totalorder %v283_v8, %v257_v5  ;;  %vm268_vm2 = vcmp.eq.s32.totalorder %v266_v9, %v256_v2  ;;  %vm270_vm3 = vcmp.eq.s32.totalorder %v266_v9, %v257_v5  ;;  %s716_s11 = scalar_lea.vmem %s715_s7, 256  ;;  %p717_p8 = scmp.lt.s32.totalorder %s986_s29, %s715_s7 }
  0x5d   : > { %vm587_vm4 = vmpackc.low %vm287_vm1, %vm285_vm0  ;;  %vm284_vm5 = vcmp.eq.s32.totalorder %v279_v10, %v256_v2  ;;  %vm286_vm6 = vcmp.eq.s32.totalorder %v279_v10, %v257_v5  ;;  %vm267_vm7 = vcmp.eq.s32.totalorder %v262_v11, %v256_v2  ;;  %vm269_vm8 = vcmp.eq.s32.totalorder %v262_v11, %v257_v5  ;;  %p713_p5 = pneg %p712_p7  ;;  %p718_p9 = scmp.lt.s32.totalorder %s716_s11, %s710_s12 }
  0x5e   : > { %588 = vmatprep.subr.msk.bf16.mxu1 %vm587_vm4, %v785_v12  ;;  %vm591_vm9 = vmpackc.low %vm270_vm3, %vm268_vm2 }
  0x5f   : > { %592 = vmatprep.subr.msk.bf16.mxu0 %vm591_vm9, %v785_v12  ;;  %vm589_vm10 = vmpackc.low %vm286_vm6, %vm284_vm5  ;;  %p719_p0 = por %p718_p9, %p717_p8 }
  0x60   : > { %590 = vmatpush1.bf16.msk.msra.mxu1 %vm589_vm10, %v785_v12  ;;  %vm593_vm11 = vmpackc.low %vm269_vm8, %vm267_vm7 }
  0x61   : > { %594 = vmatpush1.bf16.msk.msra.mxu0 %vm593_vm11, %v785_v12  ;;  %p720_p1 = pnand %p719_p0, %p713_p5 }
  0x63   : > { %573 = vmatmul.mubr.msk.f32.vlgmr.msra.gmra.mrb[0].mxu1 %vm294_vm12, %v293_v13 }
  0x64   : > { %578 = vmatmul.mubr.msk.f32.vlgmr.msra.gmra.mrb[0].mxu0 %vm294_vm12, %v292_v14 }
 0x136   : > { %v364_v15 = vpop.f32.mrb[0].mxu1 }
 0x137   : > { %v438_v16 = vpop.f32.mrb[0].mxu0  ;;  %v366_v17 = vpop.f32.mrb[1].mxu1 }
 0x138   : > { %v439_v18 = vadd.f32 %v438_v16, %v364_v15  ;;  %v440_v19 = vpop.f32.mrb[1].mxu0 }
 0x139   : > { %v441_v20 = vadd.f32 %v440_v19, %v366_v17 }
 0x13b   : > { %v445_v21 = vcombine.low %v439_v18, %v441_v20 }
 0x13d   : > { %447 = vst [vmem:[%s251_s14] sm:$0xff] %v445_v21 }
 0x13e   : > { %723 = shalt.err (!%p720_p1)
}
 0x13f   : > { %s724_s25 = scalar_lea.hbm %s984_s22, 128  ;;  %s728_s13 = scalar_lea.hbm %s1032_s4, 256 }
 0x140   : > { %p725_p11 = scmp.ne.s32.totalorder %s984_s22, %s724_s25  ;;  %p729_p4 = scmp.lt.u32.totalorder %s984_s22, %s1032_s4 }
 0x141   : > { %p730_p10 = scmp.lt.u32.totalorder %s728_s13, %s724_s25  ;;  %p732_p6 = scmp.lt.u32.totalorder %s724_s25, %s984_s22 }
 0x142   : > { %p726_p12 = pnand %p725_p11, %p1045_p13 }
 0x143   : > { %p731_p3 = por %p730_p10, %p729_p4 }
 0x144   : > { %p727_p2 = pneg %p726_p12 }
 0x145   : > { %p733_p7 = por %p732_p6, %p731_p3 }
 0x147   : > { %p734_p5 = pnand %p733_p7, %p727_p2 }
 0x149   : > { %737 = shalt.err (!%p734_p5)
}
 0x14a   : > { %601 = dma.vmem_to_hbm [thread:$0]  (%p1045_p13), %s986_s29, 128, %s984_s22, %s449_s10  }
 0x14b PF: > { %s475_s30 = sand.u32 1, %s768_s15   ;;  %p1046_p8 = scmp.ne.s32.totalorder %s1038_s28, 0 }
 0x14c   : > { %p1047_p9 = scmp.ge.s32.totalorder %s780_s18, 2  ;;  %s476_s9 = scalar_lea.sflag [#allocation4], %s475_s30 }
 0x14e   : > { %p611_p0 = pnand %p1047_p9, %p1046_p8 }
 0x150   : > { %763 = dma.done.wait (!%p611_p0), %s476_s9, 128  }
 0x151   : > { %765 = vsyncadd (!%p611_p0), %s476_s9, 4294967168  ;;  %p20_p1 = scmp.ge.s32.totalorder %s837_s21, 4   ;;  %s1048_s15 = smov %s772_s16 }
 0x152   : > { %s1049_s16 = smov %s776_s17  ;;  %s1050_s17 = smov %s849_s24 }
 0x153   : > { %s1051_s18 = smov %s837_s21  ;;  %22 = sbr.rel (!%p20_p1) target bundleno = 7 (0x7), region = 94 }
 0x15a   :  { %481 = vsyncpa [#allocation3], 1 }
 0x15b   :  { %483 = vsyncpa [#allocation3 + $0x1], 1 }
 0x15c   :  { %484 = vsyncpa [#allocation6], 1 }
 0x15d   :  { %486 = vsyncpa [#allocation6 + $0x1], 1 }
 0x15e   :  { %487 = vsyncpa [#allocation4], 1 }
 0x15f   :  { %489 = vsyncpa [#allocation4 + $0x1], 1 }

</bundles_post_ra>
